<compile_context>
chip_gen: v6e
topology: v6e:2x2x1
jax: 0.10.0
libtpu: 0.0.40
codegen_flags: <defaults>
</compile_context>

<pallas_src>
import math

import jax
import jax.numpy as jnp
from jax.experimental import pallas as pl
from jax.experimental.pallas import tpu as pltpu


def _row_parallel_kernel(x_ref, w_ref, b_ref, o_ref):
    """One grid step = one (tm, tn) output tile x one tk slice of the K sum.

    The K grid axis (axis 2, "arbitrary") plays the role of the tensor-parallel
    all-reduce: bf16 partial products are accumulated in f32 directly into the
    VMEM-resident output tile, which is seeded with the bias on the first step.
    """
    k = pl.program_id(2)

    @pl.when(k == 0)
    def _init():
        # Output tile doubles as the f32 accumulator; seed it with the bias.
        o_ref[...] = jnp.broadcast_to(b_ref[...], o_ref.shape)

    # bf16 x bf16 -> f32 on the MXU, accumulated in-place in f32.
    o_ref[...] += jnp.dot(
        x_ref[...], w_ref[...], preferred_element_type=jnp.float32
    )


def prepare_row_parallel_weight(weight_shards):
    """One-time parameter prep (NOT per forward call).

    weight_shards: [world_size, out_features, in_per_rank] f32 (PyTorch layout,
    weight_shards[r] == the module's per-rank `weight` on rank r).

    Returns the lane-dense bf16 matmul operand w_t: [in_features, out_features]
    (rank shards concatenated along K, transposed so the kernel's (tk, tn)
    weight tiles are contiguous on the lane axis).
    """
    world_size, n_out, k_per = weight_shards.shape
    w_t = jnp.transpose(weight_shards, (0, 2, 1)).reshape(world_size * k_per, n_out)
    return w_t.astype(jnp.bfloat16)


def _pick_tile(dim, cap, align):
    """Largest aligned divisor of `dim` that is <= cap; full dim if dim <= cap.

    Guarantees the returned tile is either the full dimension (always legal for
    a BlockSpec) or a multiple of `align` that divides `dim` exactly, so stores
    stay unmasked and the (8,128)/(16,128) tiling constraints hold.
    """
    if dim <= cap:
        return dim
    t = (cap // align) * align
    while t >= align:
        if dim % t == 0:
            return t
        t -= align
    # No aligned divisor found: fall back to the whole dimension (legal, just a
    # big tile).
    return dim


def _vmem_limit_bytes():
    """~75% of physical VMEM, leaving headroom for Pallas internal scratch,
    semaphores and DMA slots (v7x: 64 MiB -> 48 MiB; v5e/v6e: 128 -> 96 MiB)."""
    try:
        phys = pltpu.get_tpu_info().vmem_capacity_bytes
    except Exception:
        phys = 64 * 1024 * 1024  # conservative (v7x) fallback
    return min(int(phys * 3 // 4), 100 * 1024 * 1024)


def row_parallel_linear(x, w_t, bias, *, tm=512, tn=1024, tk=2048):
    """x: [M, K_total] (any float dtype), w_t: [K_total, N] bf16 (pre-prepared),
    bias: [N]. Returns [M, N] f32 == x @ W_full.T + bias (with the per-rank
    partial sums / all-reduce folded into the K reduction)."""
    m, k_total = x.shape
    k_w, n_out = w_t.shape
    assert k_w == k_total
    assert bias.shape == (n_out,)

    # bf16 operands (f32 accumulation happens inside the kernel / output).
    x_bf16 = x.astype(jnp.bfloat16)
    w_bf16 = w_t.astype(jnp.bfloat16)
    b2d = bias.astype(jnp.float32).reshape(1, n_out)

    # Aligned tiles: tm multiple of 16 (bf16 sublane packing), tn/tk of 128.
    tm = _pick_tile(m, tm, 16)
    tn = _pick_tile(n_out, tn, 128)
    tk = _pick_tile(k_total, tk, 128)
    assert m % tm == 0 and n_out % tn == 0 and k_total % tk == 0

    grid_m, grid_n, grid_k = m // tm, n_out // tn, k_total // tk

    # Deeper weight pipelining when M is tiny (weight-bandwidth-bound regime).
    small_m = m <= 128
    if small_m:
        def w_block(idx_map):
            return pl.BlockSpec((tk, tn), idx_map, pipeline_mode=pl.Buffered(3))
    else:
        def w_block(idx_map):
            return pl.BlockSpec((tk, tn), idx_map)

    # Put the grid axis with more tiles first so megacore (v7x, 2 TCs) shards a
    # multi-iteration parallel axis. K (the simulated all-reduce) stays last.
    if grid_m >= grid_n:
        grid = (grid_m, grid_n, grid_k)
        x_spec = pl.BlockSpec((tm, tk), lambda i, j, k: (i, k))
        w_spec = w_block(lambda i, j, k: (k, j))
        b_spec = pl.BlockSpec((1, tn), lambda i, j, k: (0, j))
        o_spec = pl.BlockSpec((tm, tn), lambda i, j, k: (i, j))
    else:
        grid = (grid_n, grid_m, grid_k)
        x_spec = pl.BlockSpec((tm, tk), lambda j, i, k: (i, k))
        w_spec = w_block(lambda j, i, k: (k, j))
        b_spec = pl.BlockSpec((1, tn), lambda j, i, k: (0, j))
        o_spec = pl.BlockSpec((tm, tn), lambda j, i, k: (i, j))

    cost = pl.CostEstimate(
        flops=2 * m * n_out * k_total,
        transcendentals=0,
        bytes_accessed=(m * k_total * 2          # x (bf16)
                        + k_total * n_out * 2    # w (bf16)
                        + n_out * 4              # bias (f32)
                        + m * n_out * 4),        # out (f32)
    )

    return pl.pallas_call(
        _row_parallel_kernel,
        out_shape=jax.ShapeDtypeStruct((m, n_out), jnp.float32),
        grid_spec=pltpu.PrefetchScalarGridSpec(
            num_scalar_prefetch=0,
            grid=grid,                       # K (reduction / "all-reduce") last
            in_specs=[x_spec, w_spec, b_spec],
            # Same block index across K -> o_ref is a VMEM-resident accumulator.
            out_specs=o_spec,
        ),
        compiler_params=pltpu.CompilerParams(
            dimension_semantics=("parallel", "parallel", "arbitrary"),
            vmem_limit_bytes=_vmem_limit_bytes(),
        ),
        cost_estimate=cost,
    )(x_bf16, w_bf16, b2d)


def _make_case(key, m, in_features, out_features, world_size):
    """Deterministic inputs matching the PyTorch module's reset_parameters:
    master weight ~ uniform(-bound, bound) with bound = sqrt(1/in_per_rank),
    split along dim 1 into per-rank shards; bias zeros."""
    k_per = in_features // world_size
    kx, kw = jax.random.split(key)
    bound = math.sqrt(1.0 / k_per)
    master_weight = jax.random.uniform(
        kw, (out_features, in_features), dtype=jnp.float32,
        minval=-bound, maxval=bound,
    )
    weight_shards = jnp.stack(
        [master_weight[:, r * k_per:(r + 1) * k_per] for r in range(world_size)],
        axis=0,
    )
    bias = jnp.zeros((out_features,), dtype=jnp.float32)
    x = jax.random.normal(kx, (m, in_features), dtype=jnp.float32)
    return x, weight_shards, bias, master_weight


if __name__ == "__main__":
    key = jax.random.PRNGKey(0)
    k1, k2 = jax.random.split(key)

    # ---- Case 1: training-style shapes; multi-step M/N/K grid exercises the
    # k==0 bias init and the K-axis (simulated all-reduce) accumulation.
    M, IN_F, OUT_F, WORLD = 256, 2048, 512, 2
    x, shards, bias, master = _make_case(k1, M, IN_F, OUT_F, WORLD)
    w_t = jax.block_until_ready(prepare_row_parallel_weight(shards))  # one-time prep

    out = jax.block_until_ready(
        row_parallel_linear(x, w_t, bias, tm=128, tn=256, tk=512)
    )
    assert out.shape == (M, OUT_F)
    # Tight check vs. a bf16-operand / f32-accumulate reference (same math).
    ref_bf16 = jnp.dot(x.astype(jnp.bfloat16), w_t,
                       preferred_element_type=jnp.float32) + bias
    assert jnp.allclose(out, ref_bf16, atol=5e-3, rtol=5e-3), "mismatch vs bf16 ref"
    # Loose check vs. the full-precision un-sharded linear (module semantics).
    ref_f32 = x @ master.T + bias
    assert jnp.allclose(out, ref_f32, atol=5e-2, rtol=5e-2), "mismatch vs f32 ref"

    # ---- Case 2: small-M inference-style shapes; exercises the N-major grid
    # ordering (megacore) and the Buffered(3) weight pipeline.
    M2, IN_F2, OUT_F2, WORLD2 = 8, 2048, 1024, 4
    x2, shards2, bias2, master2 = _make_case(k2, M2, IN_F2, OUT_F2, WORLD2)
    w_t2 = jax.block_until_ready(prepare_row_parallel_weight(shards2))

    out2 = jax.block_until_ready(
        row_parallel_linear(x2, w_t2, bias2, tn=512, tk=1024)
    )
    assert out2.shape == (M2, OUT_F2)
    ref2_bf16 = jnp.dot(x2.astype(jnp.bfloat16), w_t2,
                        preferred_element_type=jnp.float32) + bias2
    assert jnp.allclose(out2, ref2_bf16, atol=5e-3, rtol=5e-3), "mismatch vs bf16 ref (small-M)"
    ref2_f32 = x2 @ master2.T + bias2
    assert jnp.allclose(out2, ref2_f32, atol=5e-2, rtol=5e-2), "mismatch vs f32 ref (small-M)"

    print("KERNEL_OK")
</pallas_src>

<mosaic_0001>
module attributes {stable_mosaic.version = 11 : i64} {
  func.func @_row_parallel_kernel(%arg0: i32, %arg1: i32, %arg2: i32, %arg3: memref<128x512xbf16, #tpu.memory_space<vmem>>, %arg4: memref<512x256xbf16, #tpu.memory_space<vmem>>, %arg5: memref<1x256xf32, #tpu.memory_space<vmem>>, %arg6: memref<128x256xf32, #tpu.memory_space<vmem>>) attributes {dimension_semantics = [#tpu.dimension_semantics<parallel>, #tpu.dimension_semantics<parallel>, #tpu.dimension_semantics<arbitrary>], iteration_bounds = array<i64: 2, 2, 4>, scalar_prefetch = 0 : i64, scratch_operands = 0 : i64, tpu.core_type = #tpu.core_type<tc>, window_params = [{transform_indices = @transform_0, window_bounds = array<i64: 128, 512>}, {transform_indices = @transform_1, window_bounds = array<i64: 512, 256>}, {transform_indices = @transform_2, window_bounds = array<i64: 1, 256>}, {transform_indices = @transform_3, window_bounds = array<i64: 128, 256>}]} {
    %c0_i32 = arith.constant 0 : i32
    %0 = arith.cmpi eq, %arg2, %c0_i32 : i32
    %1 = arith.extui %0 : i1 to i32
    %c0_i32_0 = arith.constant 0 : i32
    %2 = arith.cmpi ne, %1, %c0_i32_0 : i32
    scf.if %2 {
      %c0_8 = arith.constant 0 : index
      %c0_9 = arith.constant 0 : index
      %9 = vector.load %arg5[%c0_8, %c0_9] : memref<1x256xf32, #tpu.memory_space<vmem>>, vector<1x256xf32>
      %10 = vector.shape_cast %9 : vector<1x256xf32> to vector<1x256xf32>
      %11 = vector.broadcast %10 : vector<1x256xf32> to vector<128x256xf32>
      %c0_10 = arith.constant 0 : index
      %c0_11 = arith.constant 0 : index
      %12 = vector.load %arg6[%c0_10, %c0_11] : memref<128x256xf32, #tpu.memory_space<vmem>>, vector<128x256xf32>
      tpu.vector_store %arg6[%c0_10, %c0_11], %11 {strides = array<i32>} : memref<128x256xf32, #tpu.memory_space<vmem>>, vector<128x256xf32>,
    } else {
    }
    %c0 = arith.constant 0 : index
    %c0_1 = arith.constant 0 : index
    %3 = vector.load %arg6[%c0, %c0_1] : memref<128x256xf32, #tpu.memory_space<vmem>>, vector<128x256xf32>
    %c0_2 = arith.constant 0 : index
    %c0_3 = arith.constant 0 : index
    %4 = vector.load %arg3[%c0_2, %c0_3] : memref<128x512xbf16, #tpu.memory_space<vmem>>, vector<128x512xbf16>
    %c0_4 = arith.constant 0 : index
    %c0_5 = arith.constant 0 : index
    %5 = vector.load %arg4[%c0_4, %c0_5] : memref<512x256xbf16, #tpu.memory_space<vmem>>, vector<512x256xbf16>
    %cst = arith.constant dense<0.000000e+00> : vector<128x256xf32>
    %6 = tpu.matmul %4, %5, %cst {dimension_numbers = #tpu.dot_dimension_numbers<[1], [0], [0], [1], [0, 0, 1, 1], [], []>} : vector<128x512xbf16>, vector<512x256xbf16>, vector<128x256xf32> -> vector<128x256xf32>
    %7 = arith.addf %3, %6 : vector<128x256xf32>
    %c0_6 = arith.constant 0 : index
    %c0_7 = arith.constant 0 : index
    %8 = vector.load %arg6[%c0_6, %c0_7] : memref<128x256xf32, #tpu.memory_space<vmem>>, vector<128x256xf32>
    tpu.vector_store %arg6[%c0_6, %c0_7], %7 {strides = array<i32>} : memref<128x256xf32, #tpu.memory_space<vmem>>, vector<128x256xf32>,
    return
  }
  func.func @transform_0(%arg0: i32, %arg1: i32, %arg2: i32) -> (i32, i32) {
    %c0_i32 = arith.constant 0 : i32
    return %arg0, %arg2 : i32, i32
  }
  func.func @transform_1(%arg0: i32, %arg1: i32, %arg2: i32) -> (i32, i32) {
    %c0_i32 = arith.constant 0 : i32
    return %arg2, %arg1 : i32, i32
  }
  func.func @transform_2(%arg0: i32, %arg1: i32, %arg2: i32) -> (i32, i32) {
    %c0_i32 = arith.constant 0 : i32
    %c0_i32_0 = arith.constant 0 : i32
    return %c0_i32, %arg1 : i32, i32
  }
  func.func @transform_3(%arg0: i32, %arg1: i32, %arg2: i32) -> (i32, i32) {
    %c0_i32 = arith.constant 0 : i32
    return %arg0, %arg1 : i32, i32
  }
}

</mosaic_0001>

<bundles_post_ra>
// kernel: tpu_custom_call.1
= control target key start
LH: loop header
LB: loop body
LE: loop exit
PB: predicated region body
PF: predicated region fallthrough
CT: control target
= control target key end

     0   :  { %s2776_s0 = inlined_call_operand.hbm [shape: bf16[256,2048], index: 0, kind: input, shape index: {}]   ;;  %s2777_s1 = inlined_call_operand.hbm [shape: bf16[2048,512], index: 1, kind: input, shape index: {}]   ;;  %s2778_s2 = inlined_call_operand.hbm [shape: f32[1,512], index: 2, kind: input, shape index: {}]   ;;  %s2779_s3 = inlined_call_operand.hbm [shape: f32[256,512], index: 3, kind: output, shape index: {}]  }
   0x1   :  { %2797 = sst [smem:[#allocation29_spill]] %s2777_s1 }
   0x2   :  { %2798 = sst [smem:[#allocation30_spill]] %s2778_s2 }
   0x3   :  { %2799 = sst [smem:[#allocation31_spill]] %s2779_s3 }
   0x4   :  { %8 = vsyncpa [#allocation3], 0 }
   0x5   :  { %10 = vsyncpa [#allocation3 + $0x1], 0 }
   0x6   :  { %11 = vsyncpa [#allocation6], 0 }
   0x7   :  { %13 = vsyncpa [#allocation6 + $0x1], 0 }
   0x8   :  { %14 = vsyncpa [#allocation4], 0 }
   0x9   :  { %16 = vsyncpa [#allocation4 + $0x1], 0  ;;  %s2175_s12 = smov 0   ;;  %s2177_s13 = smov 0  }
   0xa   :  { %s2179_s14 = smov 0   ;;  %s2181_s15 = smov 0  }
   0xb   :  { %s2183_s16 = smov 0   ;;  %s2185_s17 = smov 0  }
   0xc   :  { %s2187_s18 = smov 0   ;;  %s2189_s19 = smov 0  }
   0xd   :  { %s2191_s20 = smov 0   ;;  %s2193_s21 = smov 0  }
   0xe   :  { %s2195_s22 = smov 0   ;;  %s2197_s23 = smov 0  }
   0xf   :  { %s2199_s24 = smov 0   ;;  %s2201_s25 = smov 0  }
  0x10   :  { %s2203_s26 = smov 0   ;;  %s2205_s27 = smov 0  }
  0x11   :  { %s2207_s28 = smov 0   ;;  %s2209_s29 = smov 0  }
  0x12   :  { %s2211_s30 = smov 0  }
  0x13 LB: > { %2800 = sst [smem:[#allocation13_spill]] %s2069_s12  ;;  %s34_s4 = sadd.s32 1, %s2129_s27  ;;  %s2141_s30 = sphi %s2211_s30, %s22_s30   ;;  %s2137_s29 = sphi %s2209_s29, %s2876_s29   ;;  %s2133_s28 = sphi %s2207_s28, %s2875_s28   ;;  %s2129_s27 = sphi %s2205_s27, %s2862_s27   ;;  %s2125_s26 = sphi %s2203_s26, %s2874_s26   ;;  %s2121_s25 = sphi %s2201_s25, %s2873_s25   ;;  %s2117_s24 = sphi %s2199_s24, %s2861_s24   ;;  %s2113_s23 = sphi %s2197_s23, %s2872_s23   ;;  %s2109_s22 = sphi %s2195_s22, %s2871_s22   ;;  %s2105_s21 = sphi %s2193_s21, %s2870_s21   ;;  %s2101_s20 = sphi %s2191_s20, %s2869_s20   ;;  %s2097_s19 = sphi %s2189_s19, %s2858_s19   ;;  %s2093_s18 = sphi %s2187_s18, %s2868_s18   ;;  %s2089_s17 = sphi %s2185_s17, %s2867_s17   ;;  %s2085_s16 = sphi %s2183_s16, %s2866_s16   ;;  %s2081_s15 = sphi %s2181_s15, %s2856_s15   ;;  %s2077_s14 = sphi %s2179_s14, %s2865_s14   ;;  %s2073_s13 = sphi %s2177_s13, %s2864_s13   ;;  %s2069_s12 = sphi %s2175_s12, %s2855_s12  }
  0x14   : > { %2801 = sst [smem:[#allocation14_spill]] %s2073_s13  ;;  %s37_s5 = sadd.s32 1, %s2133_s28 }
  0x15   : > { %2802 = sst [smem:[#allocation15_spill]] %s2081_s15  ;;  %p35_p0 = scmp.ge.s32.totalorder %s34_s4, 4 }
  0x16   : > { %2803 = sst [smem:[#allocation16_spill]] %s2085_s16  ;;  %p2793_p1 = scmp.eq.s32.totalorder %s2141_s30, 0 }
  0x17   : > { %2804 = sst [smem:[#allocation17_spill]] %s2093_s18  ;;  %s78_s6 = sadd.s32 1, %s2101_s20 }
  0x18   : > { %2805 = sst [smem:[#allocation18_spill]] %s2097_s19  ;;  %p85_p2 = scmp.ne.s32.totalorder %s2101_s20, %s2097_s19 }
  0x19   : > { %2806 = sst [smem:[#allocation19_spill]] %s2101_s20  ;;  %s2878_s4 = smov (%p35_p0, %s34_s4), 0 }
  0x1a   : > { %2807 = sst [smem:[#allocation20_spill]] %s2117_s24  ;;  %s2880_s5 = smov (!%p35_p0, %s37_s5), %s2133_s28 }
  0x1b   : > { %2808 = sst [smem:[#allocation21_spill]] %s2121_s25  ;;  %s2283_s7 = ssub.s32 %s2129_s27, %s2878_s4 }
  0x1c   : > { %2809 = sst [smem:[#allocation22_spill]] %s2125_s26  ;;  %p2287_p3 = por %p85_p2, %p2793_p1 }
  0x1d   : > { %2810 = sst [smem:[#allocation23_spill]] %s2129_s27  ;;  %p39_p4 = scmp.ge.s32.totalorder %s2880_s5, 2 }
  0x1e   : > { %2811 = sst [smem:[#allocation24_spill]] %s2878_s4  ;;  %p91_p5 = scmp.ne.s32.totalorder %s2097_s19, %s2093_s18 }
  0x1f   : > { %p2794_p6 = scmp.lt.s32.totalorder %s2141_s30, 16  ;;  %s193_s10 = sand.u32 1, %s2141_s30  }
  0x20   : > { %s2298_s9 = scalar_select %p39_p4, 0, %s2880_s5  }
  0x21   : > { %s195_s3 = sand.u32 1, %s2101_s20   ;;  %s1418_s25 = sshll.u32 %s2133_s28, 1 }
  0x22   : > { %2813 = sst [smem:[#allocation25_spill]] %s2298_s9  ;;  %s2303_s11 = ssub.s32 %s2133_s28, %s2298_s9 }
  0x23   : > { %s75_s4 = sor.u32 %s2303_s11, %s2283_s7  ;;  %s1416_s26 = sshll.u32 %s195_s3, 9 }
  0x24   : > { %p76_p7 = scmp.eq.s32.totalorder %s75_s4, 0  ;;  %s1534_s2 = sshll.u32 %s2129_s27, 8 }
  0x25   : > { %s197_s12 = scalar_lea.vmem [#allocation5], %s1416_s26  ;;  %s204_s15 = sadd.s32 %s1534_s2, %s1418_s25 }
  0x26   : > { %s2310_s24 = scalar_select %p76_p7, %s2101_s20, %s78_s6  }
  0x27   : > { %s207_s13 = sshll.u32 %s197_s12, 4  ;;  %s1420_s18 = sshll.u32 %s204_s15, 6  ;;  %s208_s13 = int_to_ptr.vmem [resolvable:$true] %s207_s13 }
  0x28   : > { %2814 = sst [smem:[#allocation26_spill]] %s2310_s24  ;;  %p2317_p8 = pnand %p2794_p6, %p2287_p3 }
  0x29   : > { %s2816_s1 = sld [smem:[#allocation29_spill]]  ;;  %s2324_s4 = scalar_lea.sflag [#allocation6], %s193_s10 }
  0x2a   : > { %2817 = sst [smem:[#allocation27_spill]] %s2324_s4  ;;  %p1867_p9 = pneg %p2317_p8 }
  0x2b   : > { %s1878_s26 = scalar_lea.vmem %s208_s13, 8192  ;;  %s2143_s2 = smov [#allocation5]  }
  0x2c   : > { %p1879_p10 = scmp.ne.s32.totalorder %s208_s13, %s1878_s26  ;;  %s1883_s12 = sshll.u32 %s2143_s2, 4  ;;  %s1884_s12 = int_to_ptr.vmem [resolvable:$false] %s1883_s12 }
  0x2d   : > { %s1885_s15 = scalar_lea.vmem %s1884_s12, 16384  ;;  %p1886_p13 = scmp.lt.s32.totalorder %s208_s13, %s1884_s12 }
  0x2e   : > { %p1881_p11 = pnand %p1879_p10, %p1867_p9  ;;  %p1887_p0 = scmp.lt.s32.totalorder %s1885_s15, %s1878_s26 }
  0x2f   : > { %s206_s3 = scalar_lea.hbm %s2816_s1, %s1420_s18 }
  0x30   : > { %p1882_p12 = pneg %p1881_p11  ;;  %p1888_p2 = por %p1887_p0, %p1886_p13 }
  0x32   : > { %p1889_p3 = pnand %p1888_p2, %p1882_p12 }
  0x34   : > { %1892 = shalt.err (!%p1889_p3)
}
  0x35   : > { %s2788_s16 = smov 256   ;;  %s2145_s18 = smov 128  }
  0x36   : > { %s2146_s25 = smov 8   ;;  %p1424_p7 = scmp.ge.s32.totalorder %s2141_s30, 1 }
  0x37   : > { %1551 = dma.hbm_to_vmem [thread:$0]  (!%p2317_p8), %s206_s3, 8192, %s208_s13, %s2324_s4, %s2788_s16, %s2145_s18, %s2146_s25  }
  0x38   : > { %p234_p9 = scmp.lt.s32.totalorder %s2141_s30, 17  ;;  %s41_s8 = sadd.s32 1, %s2137_s29 }
  0x39   : > { %s2882_s8 = smov (!%p39_p4, %s41_s8), %s2137_s29  ;;  %s50_s9 = sadd.s32 1, %s2113_s23 }
  0x3a   : > { %p2334_p10 = pnand %p1424_p7, %p234_p9  ;;  %p57_p11 = scmp.ne.s32.totalorder %s2113_s23, %s2109_s22 }
  0x3b   : > { %p43_p12 = scmp.ge.s32.totalorder %s2882_s8, 2  ;;  %p63_p13 = scmp.ne.s32.totalorder %s2109_s22, %s2105_s21 }
  0x3c   : > { %s2818_s6 = scalar_select %p2334_p10, 1, 0 }
  0x3d   : > { %p2349_p8 = por %p2793_p1, %p57_p11  ;;  %s132_s19 = sadd.s32 1, %s2077_s14 }
  0x3e   : > { %2819 = sst [smem:[#allocation28_spill]] %s2818_s6  ;;  %s2884_s8 = smov (%p43_p12, %s2882_s8), 0 }
  0x3f   : > { %s169_s10 = sand.u32 1, %s2113_s23   ;;  %s1413_s3 = sshll.u32 %s2129_s27, 2 }
  0x40   : > { %s45_s5 = ssub.s32 %s2137_s29, %s2884_s8  ;;  %s1411_s12 = sshll.u32 %s169_s10, 8 }
  0x41   : > { %s47_s26 = sor.u32 %s2283_s7, %s45_s5  ;;  %s129_s2 = sor.u32 %s2303_s11, %s45_s5 }
  0x42   : > { %p48_p4 = scmp.eq.s32.totalorder %s47_s26, 0  ;;  %p130_p0 = scmp.eq.s32.totalorder %s129_s2, 0 }
  0x43   : > { %s1533_s15 = sshll.u32 %s2137_s29, 8  ;;  %s173_s24 = scalar_lea.vmem [#allocation2], %s1411_s12 }
  0x44   : > { %s2364_s18 = scalar_select %p48_p4, %s2113_s23, %s50_s9  }
  0x45   : > { %s2367_s25 = scalar_select %p130_p0, %s2077_s14, %s132_s19  }
  0x46   : > { %s180_s16 = sadd.s32 %s1533_s15, %s1413_s3  ;;  %s183_s20 = sshll.u32 %s173_s24, 4  ;;  %s184_s20 = int_to_ptr.vmem [resolvable:$true] %s183_s20 }
  0x47   : > { %s1415_s1 = sshll.u32 %s180_s16, 6  ;;  %p2376_p2 = pnand %p2794_p6, %p2349_p8 }
  0x48   : > { %s182_s27 = scalar_lea.hbm %s2776_s0, %s1415_s1  ;;  %s170_s9 = scalar_lea.sflag [#allocation3], %s169_s10 }
  0x49   : > { %p1895_p3 = pneg %p2376_p2  ;;  %s1906_s19 = scalar_lea.vmem %s184_s20, 4096 }
  0x4a   : > { %p1907_p7 = scmp.ne.s32.totalorder %s184_s20, %s1906_s19  ;;  %s2147_s24 = smov [#allocation2]  }
  0x4b   : > { %s1911_s16 = sshll.u32 %s2147_s24, 4  ;;  %s1912_s16 = int_to_ptr.vmem [resolvable:$false] %s1911_s16 }
  0x4c   : > { %p1909_p9 = pnand %p1907_p7, %p1895_p3  ;;  %s1913_s4 = scalar_lea.vmem %s1912_s16, 8192 }
  0x4d   : > { %p1914_p12 = scmp.lt.s32.totalorder %s184_s20, %s1912_s16  ;;  %p1915_p4 = scmp.lt.s32.totalorder %s1913_s4, %s1906_s19 }
  0x4e   : > { %p1910_p11 = pneg %p1909_p9 }
  0x4f   : > { %p1916_p0 = por %p1915_p4, %p1914_p12 }
  0x51   : > { %p1917_p1 = pnand %p1916_p0, %p1910_p11 }
  0x53   : > { %1920 = shalt.err (!%p1917_p1)
}
  0x54   : > { %s2148_s1 = smov 1024   ;;  %s2822_s6 = sld [smem:[#allocation16_spill]] }
  0x55   : > { %s2825_s3 = sld [smem:[#allocation15_spill]]  ;;  %s2149_s26 = smov 16  }
  0x56   : > { %s2826_s5 = sld [smem:[#allocation14_spill]]  ;;  %s2827_s2 = smov 256  }
  0x57   : > { %s2828_s12 = sld [smem:[#allocation13_spill]]  ;;  %s2386_s15 = sadd.s32 4294967295, %s2141_s30  }
  0x58   : > { %1548 = dma.hbm_to_vmem [thread:$0]  (!%p2376_p2), %s182_s27, 4096, %s184_s20, %s170_s9, %s2148_s1, %s2827_s2, %s2149_s26  }
  0x59   : > { %s1408_s19 = sadd.s32 4294967294, %s2141_s30   ;;  %p64_p1 = scmp.eq.s32.totalorder %s2386_s15, 0 }
  0x5a   : > { %p102_p8 = scmp.eq.s32.totalorder %s2303_s11, 0  ;;  %s104_s24 = sadd.s32 1, %s2089_s17 }
  0x5b   : > { %p111_p3 = scmp.ne.s32.totalorder %s2089_s17, %s2822_s6  ;;  %p2397_p7 = por %p64_p1, %p63_p13 }
  0x5c   : > { %p2404_p9 = por %p91_p5, %p64_p1  ;;  %p2831_p2 = scmp.eq.s32.totalorder %s2141_s30, 0 }
  0x5d   : > { %s2409_s20 = scalar_select %p102_p8, %s2089_s17, %s104_s24  }
  0x5e   : > { %p2413_p11 = por %p111_p3, %p2831_p2  ;;  %p117_p12 = scmp.ne.s32.totalorder %s2822_s6, %s2825_s3 }
  0x5f   : > { %p142_p4 = scmp.ne.s32.totalorder %s2077_s14, %s2826_s5  ;;  %p143_p13 = scmp.eq.s32.totalorder %s2386_s15, 15 }
  0x60   : > { %p2422_p0 = por %p117_p12, %p64_p1  ;;  %p148_p5 = scmp.ne.s32.totalorder %s2826_s5, %s2828_s12 }
  0x61   : > { %p2428_p6 = por %p143_p13, %p142_p4  ;;  %p149_p8 = scmp.eq.s32.totalorder %s1408_s19, 15 }
  0x62   : > { %s2833_s21 = scalar_select %p2422_p0, 1, 0 }
  0x63   : > { %s2834_s11 = scalar_select %p2428_p6, 1, 0 }
  0x64   : > { %s219_s9 = sand.u32 1, %s2089_s17   ;;  %s1535_s4 = sshll.u32 %s2133_s28, 5 }
  0x65   : > { %p2434_p3 = por %p149_p8, %p148_p5  ;;  %s1421_s13 = sshll.u32 %s219_s9, 1 }
  0x66   : > { %s2836_s3 = sld [smem:[#allocation30_spill]]  ;;  %s221_s2 = scalar_lea.vmem [#allocation7], %s1421_s13 }
  0x67   : > { %s2835_s1 = scalar_select %p2434_p3, 1, 0 }
  0x68   : > { %s229_s24 = sshll.u32 %s221_s2, 4  ;;  %p2837_p1 = scmp.lt.s32.totalorder %s2141_s30, 16  ;;  %s230_s24 = int_to_ptr.vmem [resolvable:$true] %s229_s24 }
  0x69   : > { %s1934_s12 = scalar_lea.vmem %s230_s24, 32  ;;  %s2150_s19 = smov [#allocation7]  }
  0x6a   : > { %p2445_p2 = pnand %p2837_p1, %p2413_p11  ;;  %p1935_p4 = scmp.ne.s32.totalorder %s230_s24, %s1934_s12 }
  0x6b   : > { %s1939_s9 = sshll.u32 %s2150_s19, 4  ;;  %s1940_s9 = int_to_ptr.vmem [resolvable:$false] %s1939_s9 }
  0x6c   : > { %s227_s26 = scalar_lea.hbm %s2836_s3, %s1535_s4  ;;  %p1923_p12 = pneg %p2445_p2 }
  0x6d   : > { %s1941_s4 = scalar_lea.vmem %s1940_s9, 64  ;;  %p1942_p8 = scmp.lt.s32.totalorder %s230_s24, %s1940_s9 }
  0x6e   : > { %p1937_p13 = pnand %p1935_p4, %p1923_p12  ;;  %p1943_p3 = scmp.lt.s32.totalorder %s1941_s4, %s1934_s12 }
  0x70   : > { %p1938_p5 = pneg %p1937_p13  ;;  %p1944_p6 = por %p1943_p3, %p1942_p8 }
  0x72   : > { %p1945_p0 = pnand %p1944_p6, %p1938_p5 }
  0x74   : > { %1948 = shalt.err (!%p1945_p0)
}
  0x75   : > { %s2839_s27 = sld [smem:[#allocation27_spill]]  ;;  %s240_s6 = sand.u32 (!%p2334_p10), 1, %s2109_s22  }
  0x76   : > { %s1425_s10 = sshll.u32 (!%p2334_p10), %s240_s6, 8  ;;  %s241_s3 = scalar_lea.sflag (!%p2334_p10), [#allocation3], %s240_s6 }
  0x77   : > { %238 = sbr.rel (%p2334_p10) target bundleno = 523 (0x20b), region = 32  ;;  %s2457_s2 = scalar_lea.vmem (!%p2334_p10), [#allocation2], %s1425_s10 }
  0x7b   : > { %1554 = dma.hbm_to_vmem [thread:$0]  (!%p2445_p2), %s227_s26, 32, %s230_s24, %s2839_s27  }
  0x7c   : > { %2052 = dma.done.wait (%p2397_p7), %s241_s3, 4096  }
  0x7d   : > { %2054 = vsyncadd (%p2397_p7), %s241_s3, 4294963200  ;;  %s2841_s12 = sld [smem:[#allocation18_spill]]  ;;  %s249_s5 = sand.u32 1, %s2386_s15  }
  0x7e   : > { %s250_s19 = scalar_lea.sflag [#allocation6], %s249_s5 }
  0x83   : > { %s251_s26 = sand.u32 1, %s2841_s12  }
  0x84   : > { %s1426_s24 = sshll.u32 %s251_s26, 9 }
  0x85   : > { %s2465_s9 = scalar_lea.vmem [#allocation5], %s1426_s24 }
  0x86   : > { %2056 = dma.done.wait (%p2404_p9), %s250_s19, 8192  }
  0x87   : > { %2058 = vsyncadd (%p2404_p9), %s250_s19, 4294959104  ;;  %s2842_s4 = sld [smem:[#allocation16_spill]]  ;;  %p2843_p6 = scmp.ne.s32.totalorder %s2833_s21, 0 }
  0x8d   : > { %s260_s27 = sand.u32 1, %s2842_s4  }
  0x8e   : > { %s1427_s13 = sshll.u32 %s260_s27, 1 }
  0x8f   : > { %s262_s16 = scalar_lea.vmem [#allocation7], %s1427_s13 }
  0x90   : > { %2060 = dma.done.wait (%p2843_p6), %s250_s19, 32  }
  0x91   : > { %2062 = vsyncadd (%p2843_p6), %s250_s19, 4294967264  ;;  %s2844_s15 = sld [smem:[#allocation14_spill]] }
  0x92   : > { %s2845_s12 = sld [smem:[#allocation20_spill]] }
  0x97   : > { %s292_s6 = sand.u32 1, %s2844_s15  }
  0x98   : > { %s1428_s10 = sshll.u32 %s292_s6, 8  ;;  %p1429_p10 = scmp.ne.s32.totalorder %s2845_s12, 0 }
  0x99   : > { %s2479_s3 = scalar_lea.vmem [#allocation8], %s1428_s10 }
  0x9a   : > { %305 = sbr.rel (%p1429_p10) target bundleno = 183 (0xb7), region = 48 }
  0x9f   : > { %v308_v0 = vlaneseq  ;;  %v306_v2 = vld [vmem:[%s262_s16] sm:$0x3] }
  0xa1   : > { %v309_v1 = vshrl.u32 %v308_v0, 7 }
  0xa3   : > { %v310_v3 = vsub.s32 0, %v309_v1  ;;  %v314_v4 = vsub.s32 1, %v309_v1 }
  0xa5   : > { %v311_v5 = vrot.slane %v306_v2, %v310_v3  ;;  %v315_v6 = vrot.slane %v306_v2, %v314_v4 }
  0xa7   : > { %318 = vst [vmem:[%s2479_s3] sm:$0xff] %v311_v5  ;;  %320 = vst [vmem:[%s2479_s3 + $0x10] sm:$0xff] %v311_v5 }
  0xa8   : > { %322 = vst [vmem:[%s2479_s3 + $0x20] sm:$0xff] %v311_v5  ;;  %324 = vst [vmem:[%s2479_s3 + $0x30] sm:$0xff] %v311_v5 }
  0xa9   : > { %326 = vst [vmem:[%s2479_s3 + $0x40] sm:$0xff] %v311_v5  ;;  %328 = vst [vmem:[%s2479_s3 + $0x50] sm:$0xff] %v311_v5 }
  0xaa   : > { %330 = vst [vmem:[%s2479_s3 + $0x60] sm:$0xff] %v311_v5  ;;  %332 = vst [vmem:[%s2479_s3 + $0x70] sm:$0xff] %v311_v5 }
  0xab   : > { %334 = vst [vmem:[%s2479_s3 + $0x80] sm:$0xff] %v311_v5  ;;  %336 = vst [vmem:[%s2479_s3 + $0x90] sm:$0xff] %v311_v5 }
  0xac   : > { %338 = vst [vmem:[%s2479_s3 + $0xa0] sm:$0xff] %v311_v5  ;;  %340 = vst [vmem:[%s2479_s3 + $0xb0] sm:$0xff] %v311_v5 }
  0xad   : > { %342 = vst [vmem:[%s2479_s3 + $0xc0] sm:$0xff] %v311_v5  ;;  %344 = vst [vmem:[%s2479_s3 + $0xd0] sm:$0xff] %v311_v5 }
  0xae   : > { %346 = vst [vmem:[%s2479_s3 + $0xe0] sm:$0xff] %v311_v5  ;;  %348 = vst [vmem:[%s2479_s3 + $0xf0] sm:$0xff] %v311_v5 }
  0xaf   : > { %319 = vst [vmem:[%s2479_s3 + $0x8] sm:$0xff] %v315_v6  ;;  %321 = vst [vmem:[%s2479_s3 + $0x18] sm:$0xff] %v315_v6 }
  0xb0   : > { %323 = vst [vmem:[%s2479_s3 + $0x28] sm:$0xff] %v315_v6  ;;  %325 = vst [vmem:[%s2479_s3 + $0x38] sm:$0xff] %v315_v6 }
  0xb1   : > { %327 = vst [vmem:[%s2479_s3 + $0x48] sm:$0xff] %v315_v6  ;;  %329 = vst [vmem:[%s2479_s3 + $0x58] sm:$0xff] %v315_v6 }
  0xb2   : > { %331 = vst [vmem:[%s2479_s3 + $0x68] sm:$0xff] %v315_v6  ;;  %333 = vst [vmem:[%s2479_s3 + $0x78] sm:$0xff] %v315_v6 }
  0xb3   : > { %335 = vst [vmem:[%s2479_s3 + $0x88] sm:$0xff] %v315_v6  ;;  %337 = vst [vmem:[%s2479_s3 + $0x98] sm:$0xff] %v315_v6 }
  0xb4   : > { %339 = vst [vmem:[%s2479_s3 + $0xa8] sm:$0xff] %v315_v6  ;;  %341 = vst [vmem:[%s2479_s3 + $0xb8] sm:$0xff] %v315_v6 }
  0xb5   : > { %343 = vst [vmem:[%s2479_s3 + $0xc8] sm:$0xff] %v315_v6  ;;  %345 = vst [vmem:[%s2479_s3 + $0xd8] sm:$0xff] %v315_v6 }
  0xb6   : > { %347 = vst [vmem:[%s2479_s3 + $0xe8] sm:$0xff] %v315_v6  ;;  %349 = vst [vmem:[%s2479_s3 + $0xf8] sm:$0xff] %v315_v6 }
  0xb7 PF: > { %v1721_v7 = vld [vmem:[%s2465_s9 + $0x74] ss:$8 sps:$4 sm:$0xff]   ;;  %v1725_v9 = vld [vmem:[%s2465_s9 + $0x70] ss:$8 sps:$4 sm:$0xff]   ;;  %v1727_v11 = vld [vmem:[%s2465_s9 + $0x64] ss:$8 sps:$4 sm:$0xff]  }
  0xb8   : > { %v1723_v8 = vld [vmem:[%s2465_s9 + $0x174] ss:$8 sps:$4 sm:$0xff]   ;;  %958 = vmatprep.subr.bf16.mxu0 %v1721_v7  ;;  %v1726_v10 = vld [vmem:[%s2465_s9 + $0x170] ss:$8 sps:$4 sm:$0xff]   ;;  %v1729_v12 = vld [vmem:[%s2465_s9 + $0x164] ss:$8 sps:$4 sm:$0xff]  }
  0xb9   : > { %1071 = vmatprep.subr.bf16.mxu1 %v1723_v8  ;;  %959 = vmatpush1.bf16.msra.mxu0 %v1725_v9  ;;  %v1731_v13 = vld [vmem:[%s2465_s9 + $0x60] ss:$8 sps:$4 sm:$0xff]   ;;  %v1733_v15 = vld [vmem:[%s2465_s9 + $0x54] ss:$8 sps:$4 sm:$0xff]   ;;  %v1737_v17 = vld [vmem:[%s2465_s9 + $0x50] ss:$8 sps:$4 sm:$0xff]  }
  0xba   : > { %1072 = vmatpush1.bf16.msra.mxu1 %v1726_v10  ;;  %960 = vmatprep.subr.bf16.mxu0 %v1727_v11  ;;  %v1732_v14 = vld [vmem:[%s2465_s9 + $0x160] ss:$8 sps:$4 sm:$0xff]   ;;  %v1735_v16 = vld [vmem:[%s2465_s9 + $0x154] ss:$8 sps:$4 sm:$0xff]   ;;  %v1738_v18 = vld [vmem:[%s2465_s9 + $0x150] ss:$8 sps:$4 sm:$0xff]  }
  0xbb   : > { %1073 = vmatprep.subr.bf16.mxu1 %v1729_v12  ;;  %v1739_v19 = vld [vmem:[%s2465_s9 + $0x44] ss:$8 sps:$4 sm:$0xff]   ;;  %v1743_v21 = vld [vmem:[%s2465_s9 + $0x40] ss:$8 sps:$4 sm:$0xff]   ;;  %v1745_v23 = vld [vmem:[%s2465_s9 + $0x34] ss:$8 sps:$4 sm:$0xff]  }
  0xbc   : > { %v1741_v20 = vld [vmem:[%s2465_s9 + $0x144] ss:$8 sps:$4 sm:$0xff]   ;;  %v1744_v22 = vld [vmem:[%s2465_s9 + $0x140] ss:$8 sps:$4 sm:$0xff]   ;;  %v1747_v24 = vld [vmem:[%s2465_s9 + $0x134] ss:$8 sps:$4 sm:$0xff]  }
  0xbd   : > { %961 = vmatpush1.bf16.msra.mxu0 %v1731_v13  ;;  %v1749_v25 = vld [vmem:[%s2465_s9 + $0x30] ss:$8 sps:$4 sm:$0xff]   ;;  %v1751_v27 = vld [vmem:[%s2465_s9 + $0x24] ss:$8 sps:$4 sm:$0xff]   ;;  %v1755_v29 = vld [vmem:[%s2465_s9 + $0x20] ss:$8 sps:$4 sm:$0xff]  }
  0xbe   : > { %1074 = vmatpush1.bf16.msra.mxu1 %v1732_v14  ;;  %962 = vmatprep.subr.bf16.mxu0 %v1733_v15  ;;  %v1750_v26 = vld [vmem:[%s2465_s9 + $0x130] ss:$8 sps:$4 sm:$0xff]   ;;  %v1753_v28 = vld [vmem:[%s2465_s9 + $0x124] ss:$8 sps:$4 sm:$0xff]   ;;  %v1756_v30 = vld [vmem:[%s2465_s9 + $0x120] ss:$8 sps:$4 sm:$0xff]  }
  0xbf   : > { %1075 = vmatprep.subr.bf16.mxu1 %v1735_v16  ;;  %v1757_v31 = vld [vmem:[%s2465_s9 + $0x14] ss:$8 sps:$4 sm:$0xff]   ;;  %v1761_v33 = vld [vmem:[%s2465_s9 + $0x10] ss:$8 sps:$4 sm:$0xff]   ;;  %v1763_v35 = vld [vmem:[%s2465_s9 + $0x4] ss:$8 sps:$4 sm:$0xff]  }
  0xc0   : > { %v1759_v32 = vld [vmem:[%s2465_s9 + $0x114] ss:$8 sps:$4 sm:$0xff]   ;;  %v1762_v34 = vld [vmem:[%s2465_s9 + $0x110] ss:$8 sps:$4 sm:$0xff]   ;;  %v1765_v36 = vld [vmem:[%s2465_s9 + $0x104] ss:$8 sps:$4 sm:$0xff]  }
  0xc1   : > { %963 = vmatpush1.bf16.msra.mxu0 %v1737_v17  ;;  %v1767_v37 = vld [vmem:[%s2465_s9] ss:$8 sps:$4 sm:$0xff]   ;;  %v1769_v39 = vld [vmem:[%s2465_s9 + $0xf4] ss:$8 sps:$4 sm:$0xff]   ;;  %v1773_v41 = vld [vmem:[%s2465_s9 + $0xf0] ss:$8 sps:$4 sm:$0xff]  }
  0xc2   : > { %1076 = vmatpush1.bf16.msra.mxu1 %v1738_v18  ;;  %964 = vmatprep.subr.bf16.mxu0 %v1739_v19  ;;  %v1768_v38 = vld [vmem:[%s2465_s9 + $0x100] ss:$8 sps:$4 sm:$0xff]   ;;  %v1771_v40 = vld [vmem:[%s2465_s9 + $0x1f4] ss:$8 sps:$4 sm:$0xff]   ;;  %v1774_v42 = vld [vmem:[%s2465_s9 + $0x1f0] ss:$8 sps:$4 sm:$0xff]  }
  0xc3   : > { %1077 = vmatprep.subr.bf16.mxu1 %v1741_v20  ;;  %v1775_v43 = vld [vmem:[%s2465_s9 + $0xe4] ss:$8 sps:$4 sm:$0xff]   ;;  %v1779_v45 = vld [vmem:[%s2465_s9 + $0xe0] ss:$8 sps:$4 sm:$0xff]   ;;  %v1781_v47 = vld [vmem:[%s2465_s9 + $0xd4] ss:$8 sps:$4 sm:$0xff]  }
  0xc4   : > { %v1777_v44 = vld [vmem:[%s2465_s9 + $0x1e4] ss:$8 sps:$4 sm:$0xff]   ;;  %v1780_v46 = vld [vmem:[%s2465_s9 + $0x1e0] ss:$8 sps:$4 sm:$0xff]   ;;  %v1783_v48 = vld [vmem:[%s2465_s9 + $0x1d4] ss:$8 sps:$4 sm:$0xff]  }
  0xc5   : > { %965 = vmatpush1.bf16.msra.mxu0 %v1743_v21  ;;  %v1785_v49 = vld [vmem:[%s2465_s9 + $0xd0] ss:$8 sps:$4 sm:$0xff]   ;;  %v1787_v51 = vld [vmem:[%s2465_s9 + $0xc4] ss:$8 sps:$4 sm:$0xff]   ;;  %v1791_v53 = vld [vmem:[%s2465_s9 + $0xc0] ss:$8 sps:$4 sm:$0xff]  }
  0xc6   : > { %1078 = vmatpush1.bf16.msra.mxu1 %v1744_v22  ;;  %966 = vmatprep.subr.bf16.mxu0 %v1745_v23  ;;  %v1786_v50 = vld [vmem:[%s2465_s9 + $0x1d0] ss:$8 sps:$4 sm:$0xff]   ;;  %v1789_v52 = vld [vmem:[%s2465_s9 + $0x1c4] ss:$8 sps:$4 sm:$0xff]   ;;  %v1792_v54 = vld [vmem:[%s2465_s9 + $0x1c0] ss:$8 sps:$4 sm:$0xff]  }
  0xc7   : > { %1079 = vmatprep.subr.bf16.mxu1 %v1747_v24  ;;  %v1793_v55 = vld [vmem:[%s2465_s9 + $0xb4] ss:$8 sps:$4 sm:$0xff]   ;;  %v1797_v59 = vld [vmem:[%s2465_s9 + $0xb0] ss:$8 sps:$4 sm:$0xff]   ;;  %v1799_v61 = vld [vmem:[%s2465_s9 + $0xa4] ss:$8 sps:$4 sm:$0xff]  }
  0xc8   : > { %v1819_v56 = vld [vmem:[%s2457_s2 + $0x4] ss:$16 sps:$4 sm:$0xff]   ;;  %v1822_v58 = vld [vmem:[%s2457_s2 + $0xc] ss:$16 sps:$4 sm:$0xff]   ;;  %v1798_v60 = vld [vmem:[%s2465_s9 + $0x1b0] ss:$8 sps:$4 sm:$0xff]  }
  0xc9   : > { %967 = vmatpush1.bf16.msra.mxu0 %v1749_v25  ;;  %v1795_v57 = vld [vmem:[%s2465_s9 + $0x1b4] ss:$8 sps:$4 sm:$0xff]   ;;  %990 = vmatprep.mubr.bf16.mxu0 %v1819_v56  ;;  %v1801_v62 = vld [vmem:[%s2465_s9 + $0x1a4] ss:$8 sps:$4 sm:$0xff]   ;;  %v1803_v63 = vld [vmem:[%s2465_s9 + $0xa0] ss:$8 sps:$4 sm:$0xff]  }
  0xca   : > { %1080 = vmatpush1.bf16.msra.mxu1 %v1750_v26  ;;  %968 = vmatprep.subr.bf16.mxu0 %v1751_v27  ;;  %v1804_v0 = vld [vmem:[%s2465_s9 + $0x1a0] ss:$8 sps:$4 sm:$0xff]   ;;  %v1805_v1 = vld [vmem:[%s2465_s9 + $0x94] ss:$8 sps:$4 sm:$0xff]   ;;  %v1809_v3 = vld [vmem:[%s2465_s9 + $0x90] ss:$8 sps:$4 sm:$0xff]  }
  0xcb   : > { %1081 = vmatprep.subr.bf16.mxu1 %v1753_v28  ;;  %1103 = vmatprep.mubr.bf16.mxu1 %v1822_v58  ;;  %v1807_v2 = vld [vmem:[%s2465_s9 + $0x194] ss:$8 sps:$4 sm:$0xff]   ;;  %v1810_v4 = vld [vmem:[%s2465_s9 + $0x190] ss:$8 sps:$4 sm:$0xff]   ;;  %v1811_v5 = vld [vmem:[%s2465_s9 + $0x84] ss:$8 sps:$4 sm:$0xff]  }
  0xcc   : > { %v1813_v6 = vld [vmem:[%s2465_s9 + $0x184] ss:$8 sps:$4 sm:$0xff]   ;;  %v1815_v7 = vld [vmem:[%s2465_s9 + $0x80] ss:$8 sps:$4 sm:$0xff]   ;;  %s2846_s7 = sld [smem:[#allocation21_spill]]  ;;  %s2686_s15 = scalar_lea.sflag [#allocation4], %s292_s6 }
  0xcd   : > { %969 = vmatpush1.bf16.msra.mxu0 %v1755_v29  ;;  %v1816_v8 = vld [vmem:[%s2465_s9 + $0x180] ss:$8 sps:$4 sm:$0xff]   ;;  %v1823_v11 = vld [vmem:[%s2457_s2 + $0x24] ss:$16 sps:$4 sm:$0xff]   ;;  %v1825_v12 = vld [vmem:[%s2457_s2 + $0x2c] ss:$16 sps:$4 sm:$0xff]  }
  0xce   : > { %1082 = vmatpush1.bf16.msra.mxu1 %v1756_v30  ;;  %970 = vmatprep.subr.bf16.mxu0 %v1757_v31  ;;  %v1817_v9 = vld [vmem:[%s2457_s2] ss:$16 sps:$4 sm:$0xff]   ;;  %v1820_v10 = vld [vmem:[%s2457_s2 + $0x8] ss:$16 sps:$4 sm:$0xff]   ;;  %v1829_v15 = vld [vmem:[%s2457_s2 + $0x44] ss:$16 sps:$4 sm:$0xff]  }
  0xcf   : > { %1083 = vmatprep.subr.bf16.mxu1 %v1759_v32  ;;  %v1827_v13 = vld [vmem:[%s2457_s2 + $0x20] ss:$16 sps:$4 sm:$0xff]   ;;  %v1828_v14 = vld [vmem:[%s2457_s2 + $0x28] ss:$16 sps:$4 sm:$0xff]   ;;  %v1831_v16 = vld [vmem:[%s2457_s2 + $0x4c] ss:$16 sps:$4 sm:$0xff]  }
  0xd0   : > { %v1833_v17 = vld [vmem:[%s2457_s2 + $0x40] ss:$16 sps:$4 sm:$0xff]   ;;  %v1834_v18 = vld [vmem:[%s2457_s2 + $0x48] ss:$16 sps:$4 sm:$0xff]   ;;  %v1835_v19 = vld [vmem:[%s2457_s2 + $0x64] ss:$16 sps:$4 sm:$0xff]  }
  0xd1   : > { %971 = vmatpush1.bf16.msra.mxu0 %v1761_v33  ;;  %v1837_v20 = vld [vmem:[%s2457_s2 + $0x6c] ss:$16 sps:$4 sm:$0xff]   ;;  %v1839_v21 = vld [vmem:[%s2457_s2 + $0x60] ss:$16 sps:$4 sm:$0xff]   ;;  %v1840_v22 = vld [vmem:[%s2457_s2 + $0x68] ss:$16 sps:$4 sm:$0xff]  }
  0xd2   : > { %1084 = vmatpush1.bf16.msra.mxu1 %v1762_v34  ;;  %972 = vmatprep.subr.bf16.mxu0 %v1763_v35  ;;  %v1841_v23 = vld [vmem:[%s2457_s2 + $0x84] ss:$16 sps:$4 sm:$0xff]   ;;  %v1843_v24 = vld [vmem:[%s2457_s2 + $0x8c] ss:$16 sps:$4 sm:$0xff]   ;;  %v1845_v25 = vld [vmem:[%s2457_s2 + $0x80] ss:$16 sps:$4 sm:$0xff]  }
  0xd3   : > { %1085 = vmatprep.subr.bf16.mxu1 %v1765_v36  ;;  %v1846_v26 = vld [vmem:[%s2457_s2 + $0x88] ss:$16 sps:$4 sm:$0xff]   ;;  %v1847_v27 = vld [vmem:[%s2457_s2 + $0xa4] ss:$16 sps:$4 sm:$0xff]   ;;  %v1849_v28 = vld [vmem:[%s2457_s2 + $0xac] ss:$16 sps:$4 sm:$0xff]  }
  0xd4   : > { %v1851_v29 = vld [vmem:[%s2457_s2 + $0xa0] ss:$16 sps:$4 sm:$0xff]   ;;  %v1852_v30 = vld [vmem:[%s2457_s2 + $0xa8] ss:$16 sps:$4 sm:$0xff]   ;;  %v1853_v31 = vld [vmem:[%s2457_s2 + $0xc4] ss:$16 sps:$4 sm:$0xff]  }
  0xd5   : > { %973 = vmatpush1.bf16.msra.mxu0 %v1767_v37  ;;  %v1855_v32 = vld [vmem:[%s2457_s2 + $0xcc] ss:$16 sps:$4 sm:$0xff]   ;;  %v1857_v33 = vld [vmem:[%s2457_s2 + $0xc0] ss:$16 sps:$4 sm:$0xff]   ;;  %v1858_v34 = vld [vmem:[%s2457_s2 + $0xc8] ss:$16 sps:$4 sm:$0xff]  }
  0xd6   : > { %1086 = vmatpush1.bf16.msra.mxu1 %v1768_v38  ;;  %974 = vmatprep.subr.bf16.mxu0 %v1769_v39  ;;  %v1859_v35 = vld [vmem:[%s2457_s2 + $0xe4] ss:$16 sps:$4 sm:$0xff]   ;;  %v1861_v36 = vld [vmem:[%s2457_s2 + $0xec] ss:$16 sps:$4 sm:$0xff]   ;;  %v1863_v37 = vld [vmem:[%s2457_s2 + $0xe0] ss:$16 sps:$4 sm:$0xff]  }
  0xd7   : > { %1087 = vmatprep.subr.bf16.mxu1 %v1771_v40  ;;  %v1864_v38 = vld [vmem:[%s2457_s2 + $0xe8] ss:$16 sps:$4 sm:$0xff]   ;;  %s2847_s21 = sld [smem:[#allocation22_spill]]  ;;  %s1528_s2 = sshll.u32 %s2846_s7, 1 }
  0xd8   : > { %v350_v40 = vld [vmem:[%s2479_s3] sm:$0xff]  ;;  %s1265_s9 = sshll.u32 %s2479_s3, 4  ;;  %s2849_s13 = sld [smem:[#allocation31_spill]]  ;;  %s2680_s9 = int_to_ptr.vmem [resolvable:$true] %s1265_s9 }
  0xd9   : > { %975 = vmatpush2.bf16.msra.mxu0 %v1773_v41  ;;  %s1949_s12 = scalar_lea.vmem %s2680_s9, 4096  ;;  %p2851_p9 = scmp.ne.s32.totalorder %s2834_s11, 0 }
  0xda   : > { %1088 = vmatpush2.bf16.msra.mxu1 %v1774_v42  ;;  %976 = vmatprep.subr.bf16.mxu0 %v1775_v43  ;;  %p1950_p7 = scmp.ne.s32.totalorder %s2680_s9, %s1949_s12  ;;  %s2151_s7 = smov [#allocation8]  }
  0xdb   : > { %1089 = vmatprep.subr.bf16.mxu1 %v1777_v44  ;;  %v351_v44 = vld [vmem:[%s2479_s3 + $0x8] sm:$0xff] }
  0xdc   : > { %p1951_p11 = pnand %p1950_p7, %p2851_p9 }
  0xdd   : > { %977 = vmatpush2.bf16.msra.mxu0 %v1779_v45  ;;  %s1536_s5 = sshll.u32 %s2847_s21, 6  ;;  %s1953_s21 = sshll.u32 %s2151_s7, 4  ;;  %s1954_s21 = int_to_ptr.vmem [resolvable:$false] %s1953_s21 }
  0xde   : > { %1090 = vmatpush2.bf16.msra.mxu1 %v1780_v46  ;;  %978 = vmatprep.subr.bf16.mxu0 %v1781_v47  ;;  %s1262_s26 = sadd.s32 %s1536_s5, %s1528_s2  ;;  %s2850_s10 = smov %s2849_s13 }
  0xdf   : > { %1091 = vmatprep.subr.bf16.mxu1 %v1783_v48  ;;  %s1530_s24 = sshll.u32 %s1262_s26, 7  ;;  %p1952_p0 = pneg %p1951_p11 }
  0xe0   : > { %s2678_s16 = scalar_lea.hbm %s2849_s13, %s1530_s24  ;;  %s1955_s2 = scalar_lea.vmem %s1954_s21, 8192 }
  0xe1   : > { %979 = vmatpush2.bf16.msra.mxu0 %v1785_v49  ;;  %v352_v49 = vld [vmem:[%s2479_s3 + $0x10] sm:$0xff]  ;;  %p1956_p3 = scmp.lt.s32.totalorder %s2680_s9, %s1954_s21  ;;  %p1957_p1 = scmp.lt.s32.totalorder %s1955_s2, %s1949_s12 }
  0xe2   : > { %1092 = vmatpush2.bf16.msra.mxu1 %v1786_v50  ;;  %980 = vmatprep.subr.bf16.mxu0 %v1787_v51 }
  0xe3   : > { %1093 = vmatprep.subr.bf16.mxu1 %v1789_v52  ;;  %p1958_p2 = por %p1957_p1, %p1956_p3 }
  0xe5   : > { %981 = vmatpush2.bf16.msra.mxu0 %v1791_v53  ;;  %p1959_p12 = pnand %p1958_p2, %p1952_p0 }
  0xe6   : > { %1094 = vmatpush2.bf16.msra.mxu1 %v1792_v54  ;;  %982 = vmatprep.subr.bf16.mxu0 %v1793_v55  ;;  %v353_v54 = vld [vmem:[%s2479_s3 + $0x18] sm:$0xff] }
  0xe7   : > { %1095 = vmatprep.subr.bf16.mxu1 %v1795_v57 }
  0xe9   : > { %983 = vmatpush2.bf16.msra.mxu0 %v1797_v59  ;;  %v354_v59 = vld [vmem:[%s2479_s3 + $0x20] sm:$0xff] }
  0xea   : > { %1096 = vmatpush2.bf16.msra.mxu1 %v1798_v60  ;;  %984 = vmatprep.subr.bf16.mxu0 %v1799_v61 }
  0xeb   : > { %1097 = vmatprep.subr.bf16.mxu1 %v1801_v62 }
  0xed   : > { %985 = vmatpush2.bf16.msra.mxu0 %v1803_v63 }
  0xee   : > { %1098 = vmatpush2.bf16.msra.mxu1 %v1804_v0  ;;  %986 = vmatprep.subr.bf16.mxu0 %v1805_v1  ;;  %v355_v0 = vld [vmem:[%s2479_s3 + $0x28] sm:$0xff] }
  0xef   : > { %1099 = vmatprep.subr.bf16.mxu1 %v1807_v2 }
  0xf1   : > { %987 = vmatpush2.bf16.msra.mxu0 %v1809_v3 }
  0xf2   : > { %1100 = vmatpush2.bf16.msra.mxu1 %v1810_v4  ;;  %988 = vmatprep.subr.bf16.mxu0 %v1811_v5  ;;  %v356_v5 = vld [vmem:[%s2479_s3 + $0x30] sm:$0xff] }
  0xf3   : > { %1101 = vmatprep.subr.bf16.mxu1 %v1813_v6 }
  0xf5   : > { %989 = vmatpush2.bf16.msra.mxu0 %v1815_v7 }
  0xf6   : > { %1102 = vmatpush2.bf16.msra.mxu1 %v1816_v8 }
  0xf8   : > { %991 = vmatmul.mubr.bf16.vlgmr.msra.gmra.mxu0 %v1817_v9 }
  0xf9   : > { %1104 = vmatmul.mubr.bf16.vlgmr.msra.gmra.mxu1 %v1820_v10  ;;  %1000 = vmatprep.mubr.bf16.mxu0 %v1823_v11  ;;  %v357_v10 = vld [vmem:[%s2479_s3 + $0x38] sm:$0xff] }
  0xfa   : > { %1113 = vmatprep.mubr.bf16.mxu1 %v1825_v12 }
 0x100   : > { %1001 = vmatmul.mubr.bf16.gmra.mxu0 %v1827_v13 }
 0x101   : > { %1114 = vmatmul.mubr.bf16.gmra.mxu1 %v1828_v14  ;;  %1010 = vmatprep.mubr.bf16.mxu0 %v1829_v15  ;;  %v358_v15 = vld [vmem:[%s2479_s3 + $0x40] sm:$0xff] }
 0x102   : > { %1123 = vmatprep.mubr.bf16.mxu1 %v1831_v16 }
 0x108   : > { %1011 = vmatmul.mubr.bf16.gmra.mxu0 %v1833_v17 }
 0x109   : > { %1124 = vmatmul.mubr.bf16.gmra.mxu1 %v1834_v18  ;;  %1020 = vmatprep.mubr.bf16.mxu0 %v1835_v19 }
 0x10a   : > { %1133 = vmatprep.mubr.bf16.mxu1 %v1837_v20  ;;  %v359_v20 = vld [vmem:[%s2479_s3 + $0x48] sm:$0xff] }
 0x110   : > { %1021 = vmatmul.mubr.bf16.gmra.mxu0 %v1839_v21 }
 0x111   : > { %1134 = vmatmul.mubr.bf16.gmra.mxu1 %v1840_v22  ;;  %1030 = vmatprep.mubr.bf16.mxu0 %v1841_v23 }
 0x112   : > { %1143 = vmatprep.mubr.bf16.mxu1 %v1843_v24 }
 0x118   : > { %1031 = vmatmul.mubr.bf16.gmra.mxu0 %v1845_v25  ;;  %v360_v25 = vld [vmem:[%s2479_s3 + $0x50] sm:$0xff] }
 0x119   : > { %1144 = vmatmul.mubr.bf16.gmra.mxu1 %v1846_v26  ;;  %1040 = vmatprep.mubr.bf16.mxu0 %v1847_v27 }
 0x11a   : > { %1153 = vmatprep.mubr.bf16.mxu1 %v1849_v28 }
 0x120   : > { %1041 = vmatmul.mubr.bf16.gmra.mxu0 %v1851_v29 }
 0x121   : > { %1154 = vmatmul.mubr.bf16.gmra.mxu1 %v1852_v30  ;;  %1050 = vmatprep.mubr.bf16.mxu0 %v1853_v31  ;;  %v361_v30 = vld [vmem:[%s2479_s3 + $0x58] sm:$0xff] }
 0x122   : > { %1163 = vmatprep.mubr.bf16.mxu1 %v1855_v32 }
 0x128   : > { %1051 = vmatmul.mubr.bf16.gmra.mxu0 %v1857_v33 }
 0x129   : > { %1164 = vmatmul.mubr.bf16.gmra.mxu1 %v1858_v34  ;;  %1060 = vmatprep.mubr.bf16.mxu0 %v1859_v35  ;;  %v362_v35 = vld [vmem:[%s2479_s3 + $0x60] sm:$0xff] }
 0x12a   : > { %1173 = vmatprep.mubr.bf16.mxu1 %v1861_v36 }
 0x130   : > { %1061 = vmatmul.mubr.bf16.gmra.mxu0 %v1863_v37 }
 0x131   : > { %1174 = vmatmul.mubr.bf16.gmra.mxu1 %v1864_v38 }
 0x1b8   : > { %v992_v39 = vpop.f32.mrf.mxu0 }
 0x1b9   : > { %v1105_v41 = vpop.f32.mrf.mxu1 }
 0x1ba   : > { %v1106_v42 = vadd.f32 %v1105_v41, %v992_v39  ;;  %v994_v43 = vpop.f32.mrf.mxu0 }
 0x1bb   : > { %v1107_v45 = vpop.f32.mrf.mxu1 }
 0x1bc   : > { %v1184_v46 = vadd.f32 %v1106_v42, %v350_v40  ;;  %v1108_v47 = vadd.f32 %v1107_v45, %v994_v43  ;;  %v996_v48 = vpop.f32.mrf.mxu0  ;;  %v363_v40 = vld [vmem:[%s2479_s3 + $0x68] sm:$0xff]  ;;  %v364_v45 = vld [vmem:[%s2479_s3 + $0x70] sm:$0xff] }
 0x1bd   : > { %v1109_v50 = vpop.f32.mrf.mxu1 }
 0x1be   : > { %1216 = vst [vmem:[%s2479_s3] sm:$0xff] %v1184_v46  ;;  %v1185_v51 = vadd.f32 %v1108_v47, %v351_v44  ;;  %v1110_v52 = vadd.f32 %v1109_v50, %v996_v48  ;;  %v998_v53 = vpop.f32.mrf.mxu0  ;;  %v365_v50 = vld [vmem:[%s2479_s3 + $0x78] sm:$0xff] }
 0x1bf   : > { %v1111_v55 = vpop.f32.mrf.mxu1 }
 0x1c0   : > { %1217 = vst [vmem:[%s2479_s3 + $0x8] sm:$0xff] %v1185_v51  ;;  %v1186_v56 = vadd.f32 %v1110_v52, %v352_v49  ;;  %v1112_v57 = vadd.f32 %v1111_v55, %v998_v53  ;;  %v1002_v58 = vpop.f32.mrf.mxu0  ;;  %v366_v55 = vld [vmem:[%s2479_s3 + $0x80] sm:$0xff] }
 0x1c1   : > { %v1115_v60 = vpop.f32.mrf.mxu1 }
 0x1c2   : > { %1218 = vst [vmem:[%s2479_s3 + $0x10] sm:$0xff] %v1186_v56  ;;  %v1187_v61 = vadd.f32 %v1112_v57, %v353_v54  ;;  %v1116_v62 = vadd.f32 %v1115_v60, %v1002_v58  ;;  %v1004_v63 = vpop.f32.mrf.mxu0  ;;  %v367_v60 = vld [vmem:[%s2479_s3 + $0x88] sm:$0xff] }
 0x1c3   : > { %v1117_v1 = vpop.f32.mrf.mxu1 }
 0x1c4   : > { %1219 = vst [vmem:[%s2479_s3 + $0x18] sm:$0xff] %v1187_v61  ;;  %v1188_v2 = vadd.f32 %v1116_v62, %v354_v59  ;;  %v1118_v3 = vadd.f32 %v1117_v1, %v1004_v63  ;;  %v1006_v4 = vpop.f32.mrf.mxu0  ;;  %v368_v1 = vld [vmem:[%s2479_s3 + $0x90] sm:$0xff] }
 0x1c5   : > { %v1119_v6 = vpop.f32.mrf.mxu1 }
 0x1c6   : > { %1220 = vst [vmem:[%s2479_s3 + $0x20] sm:$0xff] %v1188_v2  ;;  %v1189_v7 = vadd.f32 %v1118_v3, %v355_v0  ;;  %v1120_v8 = vadd.f32 %v1119_v6, %v1006_v4  ;;  %v1008_v9 = vpop.f32.mrf.mxu0  ;;  %v369_v6 = vld [vmem:[%s2479_s3 + $0x98] sm:$0xff] }
 0x1c7   : > { %v1121_v11 = vpop.f32.mrf.mxu1 }
 0x1c8   : > { %1221 = vst [vmem:[%s2479_s3 + $0x28] sm:$0xff] %v1189_v7  ;;  %v1190_v12 = vadd.f32 %v1120_v8, %v356_v5  ;;  %v1122_v13 = vadd.f32 %v1121_v11, %v1008_v9  ;;  %v1012_v14 = vpop.f32.mrf.mxu0  ;;  %v370_v11 = vld [vmem:[%s2479_s3 + $0xa0] sm:$0xff] }
 0x1c9   : > { %v1125_v16 = vpop.f32.mrf.mxu1 }
 0x1ca   : > { %1222 = vst [vmem:[%s2479_s3 + $0x30] sm:$0xff] %v1190_v12  ;;  %v1191_v17 = vadd.f32 %v1122_v13, %v357_v10  ;;  %v1126_v18 = vadd.f32 %v1125_v16, %v1012_v14  ;;  %v1014_v19 = vpop.f32.mrf.mxu0  ;;  %v371_v16 = vld [vmem:[%s2479_s3 + $0xa8] sm:$0xff] }
 0x1cb   : > { %v1127_v21 = vpop.f32.mrf.mxu1 }
 0x1cc   : > { %1223 = vst [vmem:[%s2479_s3 + $0x38] sm:$0xff] %v1191_v17  ;;  %v1192_v22 = vadd.f32 %v1126_v18, %v358_v15  ;;  %v1128_v23 = vadd.f32 %v1127_v21, %v1014_v19  ;;  %v1016_v24 = vpop.f32.mrf.mxu0  ;;  %v372_v21 = vld [vmem:[%s2479_s3 + $0xb0] sm:$0xff] }
 0x1cd   : > { %v1129_v26 = vpop.f32.mrf.mxu1 }
 0x1ce   : > { %1224 = vst [vmem:[%s2479_s3 + $0x40] sm:$0xff] %v1192_v22  ;;  %v1193_v27 = vadd.f32 %v1128_v23, %v359_v20  ;;  %v1130_v28 = vadd.f32 %v1129_v26, %v1016_v24  ;;  %v1018_v29 = vpop.f32.mrf.mxu0  ;;  %v373_v26 = vld [vmem:[%s2479_s3 + $0xb8] sm:$0xff] }
 0x1cf   : > { %v1131_v31 = vpop.f32.mrf.mxu1 }
 0x1d0   : > { %1225 = vst [vmem:[%s2479_s3 + $0x48] sm:$0xff] %v1193_v27  ;;  %v1194_v32 = vadd.f32 %v1130_v28, %v360_v25  ;;  %v1132_v33 = vadd.f32 %v1131_v31, %v1018_v29  ;;  %v1022_v34 = vpop.f32.mrf.mxu0  ;;  %v374_v31 = vld [vmem:[%s2479_s3 + $0xc0] sm:$0xff] }
 0x1d1   : > { %v1135_v36 = vpop.f32.mrf.mxu1 }
 0x1d2   : > { %1226 = vst [vmem:[%s2479_s3 + $0x50] sm:$0xff] %v1194_v32  ;;  %v1195_v37 = vadd.f32 %v1132_v33, %v361_v30  ;;  %v1136_v38 = vadd.f32 %v1135_v36, %v1022_v34  ;;  %v1024_v39 = vpop.f32.mrf.mxu0  ;;  %v375_v36 = vld [vmem:[%s2479_s3 + $0xc8] sm:$0xff] }
 0x1d3   : > { %v1137_v41 = vpop.f32.mrf.mxu1 }
 0x1d4   : > { %1227 = vst [vmem:[%s2479_s3 + $0x58] sm:$0xff] %v1195_v37  ;;  %v1196_v42 = vadd.f32 %v1136_v38, %v362_v35  ;;  %v1138_v43 = vadd.f32 %v1137_v41, %v1024_v39  ;;  %v1026_v44 = vpop.f32.mrf.mxu0  ;;  %v376_v41 = vld [vmem:[%s2479_s3 + $0xd0] sm:$0xff] }
 0x1d5   : > { %v1139_v46 = vpop.f32.mrf.mxu1 }
 0x1d6   : > { %1228 = vst [vmem:[%s2479_s3 + $0x60] sm:$0xff] %v1196_v42  ;;  %v1197_v47 = vadd.f32 %v1138_v43, %v363_v40  ;;  %v1140_v48 = vadd.f32 %v1139_v46, %v1026_v44  ;;  %v1028_v49 = vpop.f32.mrf.mxu0  ;;  %v377_v46 = vld [vmem:[%s2479_s3 + $0xd8] sm:$0xff] }
 0x1d7   : > { %v1141_v51 = vpop.f32.mrf.mxu1 }
 0x1d8   : > { %1229 = vst [vmem:[%s2479_s3 + $0x68] sm:$0xff] %v1197_v47  ;;  %v1198_v52 = vadd.f32 %v1140_v48, %v364_v45  ;;  %v1142_v53 = vadd.f32 %v1141_v51, %v1028_v49  ;;  %v1032_v54 = vpop.f32.mrf.mxu0  ;;  %v378_v51 = vld [vmem:[%s2479_s3 + $0xe0] sm:$0xff] }
 0x1d9   : > { %v1145_v56 = vpop.f32.mrf.mxu1 }
 0x1da   : > { %1230 = vst [vmem:[%s2479_s3 + $0x70] sm:$0xff] %v1198_v52  ;;  %v1199_v57 = vadd.f32 %v1142_v53, %v365_v50  ;;  %v1146_v58 = vadd.f32 %v1145_v56, %v1032_v54  ;;  %v1034_v59 = vpop.f32.mrf.mxu0  ;;  %v379_v56 = vld [vmem:[%s2479_s3 + $0xe8] sm:$0xff] }
 0x1db   : > { %v1147_v61 = vpop.f32.mrf.mxu1 }
 0x1dc   : > { %1231 = vst [vmem:[%s2479_s3 + $0x78] sm:$0xff] %v1199_v57  ;;  %v1200_v62 = vadd.f32 %v1146_v58, %v366_v55  ;;  %v1148_v63 = vadd.f32 %v1147_v61, %v1034_v59  ;;  %v1036_v0 = vpop.f32.mrf.mxu0  ;;  %v380_v61 = vld [vmem:[%s2479_s3 + $0xf0] sm:$0xff] }
 0x1dd   : > { %v1149_v2 = vpop.f32.mrf.mxu1 }
 0x1de   : > { %1232 = vst [vmem:[%s2479_s3 + $0x80] sm:$0xff] %v1200_v62  ;;  %v1201_v3 = vadd.f32 %v1148_v63, %v367_v60  ;;  %v1150_v4 = vadd.f32 %v1149_v2, %v1036_v0  ;;  %v1038_v5 = vpop.f32.mrf.mxu0  ;;  %v381_v2 = vld [vmem:[%s2479_s3 + $0xf8] sm:$0xff] }
 0x1df   : > { %v1151_v7 = vpop.f32.mrf.mxu1 }
 0x1e0   : > { %1233 = vst [vmem:[%s2479_s3 + $0x88] sm:$0xff] %v1201_v3  ;;  %v1202_v8 = vadd.f32 %v1150_v4, %v368_v1  ;;  %v1152_v9 = vadd.f32 %v1151_v7, %v1038_v5  ;;  %v1042_v10 = vpop.f32.mrf.mxu0 }
 0x1e1   : > { %v1155_v12 = vpop.f32.mrf.mxu1 }
 0x1e2   : > { %1234 = vst [vmem:[%s2479_s3 + $0x90] sm:$0xff] %v1202_v8  ;;  %v1203_v13 = vadd.f32 %v1152_v9, %v369_v6  ;;  %v1156_v14 = vadd.f32 %v1155_v12, %v1042_v10  ;;  %v1044_v15 = vpop.f32.mrf.mxu0 }
 0x1e3   : > { %v1157_v17 = vpop.f32.mrf.mxu1 }
 0x1e4   : > { %1235 = vst [vmem:[%s2479_s3 + $0x98] sm:$0xff] %v1203_v13  ;;  %v1204_v18 = vadd.f32 %v1156_v14, %v370_v11  ;;  %v1158_v19 = vadd.f32 %v1157_v17, %v1044_v15  ;;  %v1046_v20 = vpop.f32.mrf.mxu0 }
 0x1e5   : > { %v1159_v22 = vpop.f32.mrf.mxu1 }
 0x1e6   : > { %1236 = vst [vmem:[%s2479_s3 + $0xa0] sm:$0xff] %v1204_v18  ;;  %v1205_v23 = vadd.f32 %v1158_v19, %v371_v16  ;;  %v1160_v24 = vadd.f32 %v1159_v22, %v1046_v20  ;;  %v1048_v25 = vpop.f32.mrf.mxu0 }
 0x1e7   : > { %v1161_v27 = vpop.f32.mrf.mxu1 }
 0x1e8   : > { %1237 = vst [vmem:[%s2479_s3 + $0xa8] sm:$0xff] %v1205_v23  ;;  %v1206_v28 = vadd.f32 %v1160_v24, %v372_v21  ;;  %v1162_v29 = vadd.f32 %v1161_v27, %v1048_v25  ;;  %v1052_v30 = vpop.f32.mrf.mxu0 }
 0x1e9   : > { %v1165_v32 = vpop.f32.mrf.mxu1 }
 0x1ea   : > { %1238 = vst [vmem:[%s2479_s3 + $0xb0] sm:$0xff] %v1206_v28  ;;  %v1207_v33 = vadd.f32 %v1162_v29, %v373_v26  ;;  %v1166_v34 = vadd.f32 %v1165_v32, %v1052_v30  ;;  %v1054_v35 = vpop.f32.mrf.mxu0 }
 0x1eb   : > { %v1167_v37 = vpop.f32.mrf.mxu1 }
 0x1ec   : > { %1239 = vst [vmem:[%s2479_s3 + $0xb8] sm:$0xff] %v1207_v33  ;;  %v1208_v38 = vadd.f32 %v1166_v34, %v374_v31  ;;  %v1168_v39 = vadd.f32 %v1167_v37, %v1054_v35  ;;  %v1056_v40 = vpop.f32.mrf.mxu0 }
 0x1ed   : > { %v1169_v42 = vpop.f32.mrf.mxu1 }
 0x1ee   : > { %1240 = vst [vmem:[%s2479_s3 + $0xc0] sm:$0xff] %v1208_v38  ;;  %v1209_v43 = vadd.f32 %v1168_v39, %v375_v36  ;;  %v1170_v44 = vadd.f32 %v1169_v42, %v1056_v40  ;;  %v1058_v45 = vpop.f32.mrf.mxu0 }
 0x1ef   : > { %v1171_v47 = vpop.f32.mrf.mxu1 }
 0x1f0   : > { %1241 = vst [vmem:[%s2479_s3 + $0xc8] sm:$0xff] %v1209_v43  ;;  %v1210_v48 = vadd.f32 %v1170_v44, %v376_v41  ;;  %v1172_v49 = vadd.f32 %v1171_v47, %v1058_v45  ;;  %v1062_v50 = vpop.f32.mrf.mxu0 }
 0x1f1   : > { %v1175_v52 = vpop.f32.mrf.mxu1 }
 0x1f2   : > { %1242 = vst [vmem:[%s2479_s3 + $0xd0] sm:$0xff] %v1210_v48  ;;  %v1211_v53 = vadd.f32 %v1172_v49, %v377_v46  ;;  %v1176_v54 = vadd.f32 %v1175_v52, %v1062_v50  ;;  %v1064_v55 = vpop.f32.mrf.mxu0 }
 0x1f3   : > { %v1177_v57 = vpop.f32.mrf.mxu1 }
 0x1f4   : > { %1243 = vst [vmem:[%s2479_s3 + $0xd8] sm:$0xff] %v1211_v53  ;;  %v1212_v58 = vadd.f32 %v1176_v54, %v378_v51  ;;  %v1178_v59 = vadd.f32 %v1177_v57, %v1064_v55  ;;  %v1066_v60 = vpop.f32.mrf.mxu0 }
 0x1f5   : > { %v1179_v62 = vpop.f32.mrf.mxu1 }
 0x1f6   : > { %1244 = vst [vmem:[%s2479_s3 + $0xe0] sm:$0xff] %v1212_v58  ;;  %v1213_v63 = vadd.f32 %v1178_v59, %v379_v56  ;;  %v1180_v0 = vadd.f32 %v1179_v62, %v1066_v60  ;;  %v1068_v1 = vpop.f32.mrf.mxu0 }
 0x1f7   : > { %v1181_v3 = vpop.f32.mrf.mxu1 }
 0x1f8   : > { %1245 = vst [vmem:[%s2479_s3 + $0xe8] sm:$0xff] %v1213_v63  ;;  %v1214_v4 = vadd.f32 %v1180_v0, %v380_v61  ;;  %v1182_v5 = vadd.f32 %v1181_v3, %v1068_v1 }
 0x1fa   : > { %1246 = vst [vmem:[%s2479_s3 + $0xf0] sm:$0xff] %v1214_v4  ;;  %v1215_v6 = vadd.f32 %v1182_v5, %v381_v2 }
 0x1fc   : > { %1247 = vst [vmem:[%s2479_s3 + $0xf8] sm:$0xff] %v1215_v6 }
 0x1fd   : > { %1962 = shalt.err (!%p1959_p12)
}
 0x1fe   : > { %s1963_s6 = scalar_lea.hbm %s2678_s16, 4096  ;;  %s1967_s26 = scalar_lea.hbm %s2850_s10, 16384 }
 0x1ff   : > { %p1964_p4 = scmp.ne.s32.totalorder %s2678_s16, %s1963_s6  ;;  %p1968_p8 = scmp.lt.s32.totalorder %s2678_s16, %s2850_s10 }
 0x200   : > { %p1969_p6 = scmp.lt.s32.totalorder %s1967_s26, %s1963_s6 }
 0x201   : > { %p1965_p13 = pnand %p1964_p4, %p2851_p9 }
 0x202   : > { %p1970_p10 = por %p1969_p6, %p1968_p8 }
 0x203   : > { %p1966_p5 = pneg %p1965_p13 }
 0x205   : > { %p1971_p7 = pnand %p1970_p10, %p1966_p5 }
 0x207   : > { %1974 = shalt.err (!%p1971_p7)
}
 0x208   : > { %s2152_s4 = smov 256   ;;  %s2153_s27 = smov 512  }
 0x209   : > { %s2154_s13 = smov 16  }
 0x20a   : > { %1543 = dma.vmem_to_hbm [thread:$0]  (%p2851_p9), %s2680_s9, 4096, %s2678_s16, %s2686_s15, %s2152_s4, %s2153_s27, %s2154_s13  }
 0x20b PF: > { %s2852_s12 = sld [smem:[#allocation13_spill]]  ;;  %p1560_p11 = scmp.ge.s32.totalorder %s2141_s30, 2 }
 0x20c   : > { %p2853_p0 = scmp.ne.s32.totalorder %s2835_s1, 0 }
 0x20e   : > { %p1556_p3 = pnand %p1560_p11, %p2853_p0 }
 0x210   : > { %p1557_p1 = pneg %p1556_p3 }
 0x211   : > { %s1280_s7 = sand.u32 1, %s2852_s12  }
 0x212   : > { %s1281_s21 = scalar_lea.sflag [#allocation4], %s1280_s7 }
 0x213   : > { %2064 = dma.done.wait (%p1557_p1), %s1281_s21, 4096  }
 0x214   : > { %2066 = vsyncadd (%p1557_p1), %s1281_s21, 4294963200  ;;  %s22_s30 = sadd.s32 1, %s2141_s30   ;;  %s2855_s12 = sld [smem:[#allocation14_spill]] }
 0x215   : > { %p2714_p2 = scmp.ge.s32.totalorder %s22_s30, 18   ;;  %s2856_s15 = sld [smem:[#allocation16_spill]] }
 0x216   : > { %s2857_s11 = sld [smem:[#allocation18_spill]]  ;;  %s2860_s9 = smov %s2364_s18 }
 0x217   : > { %s2858_s19 = sld [smem:[#allocation19_spill]]  ;;  %s2864_s13 = smov %s2077_s14 }
 0x218   : > { %s2859_s1 = sld [smem:[#allocation26_spill]]  ;;  %s2865_s14 = smov %s2367_s25 }
 0x219   : > { %s2861_s24 = sld [smem:[#allocation23_spill]]  ;;  %s2866_s16 = smov %s2089_s17 }
 0x21a   : > { %s2862_s27 = sld [smem:[#allocation24_spill]]  ;;  %s2867_s17 = smov %s2409_s20 }
 0x21b   : > { %s2863_s6 = sld [smem:[#allocation25_spill]]  ;;  %s2870_s21 = smov %s2109_s22 }
 0x21c   : > { %s2868_s18 = smov %s2857_s11  ;;  %s2871_s22 = smov %s2113_s23 }
 0x21d   : > { %s2872_s23 = smov %s2860_s9  ;;  %s2873_s25 = smov %s2133_s28 }
 0x21e   : > { %s2869_s20 = smov %s2859_s1  ;;  %s2874_s26 = smov %s2137_s29 }
 0x21f   : > { %s2876_s29 = smov %s2884_s8  ;;  %21 = sbr.rel (!%p2714_p2) target bundleno = 19 (0x13), region = 105 }
 0x221   : > { %s2875_s28 = smov %s2863_s6 }
 0x224   :  { %1286 = vsyncpa [#allocation3], 1 }
 0x225   :  { %1288 = vsyncpa [#allocation3 + $0x1], 1 }
 0x226   :  { %1289 = vsyncpa [#allocation6], 1 }
 0x227   :  { %1291 = vsyncpa [#allocation6 + $0x1], 1 }
 0x228   :  { %1292 = vsyncpa [#allocation4], 1 }
 0x229   :  { %1294 = vsyncpa [#allocation4 + $0x1], 1 }

</bundles_post_ra>
